<compile_context>
chip_gen: v7x
topology: tpu7x:2x2x1
jax: 0.10.0
libtpu: 0.0.40
codegen_flags: <defaults>
</compile_context>

<pallas_src>
import functools

import jax
import jax.numpy as jnp
from jax.experimental import pallas as pl
from jax.experimental.pallas import tpu as pltpu

INPUT_SIZE = 138
HIDDEN_SIZE = 50
OUTPUT_SIZE = 1
HIDDEN_PAD = 128   # hidden dim zero-padded to one full lane width (exact)
LANES = 128


def _round_up(x, m):
    return ((x + m - 1) // m) * m


def _choose_tile(B, tile_rows):
    """Pick a batch tile (multiple of 128) that avoids padding x whenever
    possible (i.e. never produces a block taller than the x array)."""
    tile_rows = int(tile_rows)
    if B <= LANES:
        return LANES                                   # single tiny (padded) tile
    if B <= tile_rows:
        if B % LANES == 0:
            return B                                   # single exact tile
        if B >= 8 * LANES:
            # Multi-tile with a clipped last block; tb % 1024 == 0 keeps the
            # output block's sublane dim a multiple of 8.
            return (B // (8 * LANES)) * (8 * LANES)
        return _round_up(B, LANES)                     # small single padded tile
    if tile_rows % (8 * LANES) != 0:
        raise ValueError("tile_rows must be a multiple of 1024 when B > tile_rows")
    return tile_rows


def mlp_kernel(x_ref, w1_ref, b1_ref, w2_ref, b2_ref, o_ref):
    """Fused  y = relu(x @ W1 + b1) @ w2 + b2  for one batch tile.

    x_ref : [TB, 138]        f32   (streamed straight from HBM, double-buffered)
    w1_ref: [138, 128]       bf16  (resident)
    b1_ref: [1, 128]         f32   (resident)
    w2_ref: [1, 128]         f32   (fc2 weight as a row, resident)
    b2_ref: [1, 1]           f32   (SMEM scalar)
    o_ref : [TB//128, 128]   f32   (lane-dense output slab block)
    """
    # Cast in-kernel (VPU) so the wrapper never materializes a bf16 copy of x
    # in HBM; fc1 runs on the MXU with f32 accumulation.
    x_bf16 = x_ref[...].astype(jnp.bfloat16)
    h = jnp.dot(x_bf16, w1_ref[...], preferred_element_type=jnp.float32)
    h = jnp.maximum(h + b1_ref[...], 0.0)                  # bias + relu (VPU)

    # fc2 (N=1): elementwise multiply (VPU) + lane reduction (XLU).  The
    # reduce is shaped so the result is already the lane-dense output slab
    # (slab[r, c] == y[r*128 + c]) -- no width-1 masked stores, no extra
    # relayout of the output.
    hw = h * w2_ref[...]                                   # [TB, 128] f32
    tb_sub, lanes = o_ref.shape
    hw3 = hw.reshape(tb_sub, lanes, hw.shape[-1])          # leading-dim split (free)
    y = jnp.sum(hw3, axis=-1) + b2_ref[0, 0]               # [TB//128, 128]

    o_ref[...] = y.astype(o_ref.dtype)


@functools.partial(jax.jit, static_argnames=("tile_rows",))
def mlp_forward(x, w1, b1, w2, b2, tile_rows=8192):
    """y = relu(x @ w1 + b1) @ w2 + b2.

    x: [B, 138] float; w1: [138, 50]; b1: [1, 50]; w2: [50, 1]; b2: [1, 1].
    Returns [B, 1] in x.dtype.
    """
    B = x.shape[0]
    out_dtype = x.dtype

    tb = _choose_tile(B, tile_rows)
    num_tiles = pl.cdiv(B, tb)
    b_pad = num_tiles * tb                                 # output-slab padding only
    tb_sub = tb // LANES

    # x is only padded in the small single-tile case (block taller than the
    # array); for B >= 1024 (or any multiple of 128) it streams untouched and
    # the last grid block is simply clipped by the DMA.
    x_in = jnp.pad(x, ((0, tb - B), (0, 0))) if tb > B else x

    # Small resident operands: zero-pad hidden 50 -> 128 (numerically exact),
    # cast W1 to bf16.  These are tiny one-time ops.
    w1p = jnp.pad(w1.astype(jnp.bfloat16),
                  ((0, 0), (0, HIDDEN_PAD - HIDDEN_SIZE)))
    b1p = jnp.pad(b1.astype(jnp.float32).reshape(1, HIDDEN_SIZE),
                  ((0, 0), (0, HIDDEN_PAD - HIDDEN_SIZE)))
    w2p = jnp.pad(w2.astype(jnp.float32).reshape(HIDDEN_SIZE, OUTPUT_SIZE).T,
                  ((0, 0), (0, HIDDEN_PAD - HIDDEN_SIZE)))          # [1, 128]
    b2p = b2.astype(jnp.float32).reshape(1, 1)

    out_slab = pl.pallas_call(
        mlp_kernel,
        out_shape=jax.ShapeDtypeStruct((b_pad // LANES, LANES), jnp.float32),
        grid_spec=pltpu.PrefetchScalarGridSpec(
            num_scalar_prefetch=0,
            grid=(num_tiles,),
            in_specs=[
                pl.BlockSpec((tb, INPUT_SIZE), lambda i: (i, 0)),          # x tile (f32)
                pl.BlockSpec((INPUT_SIZE, HIDDEN_PAD), lambda i: (0, 0)),  # W1 resident
                pl.BlockSpec((1, HIDDEN_PAD), lambda i: (0, 0)),           # b1 resident
                pl.BlockSpec((1, HIDDEN_PAD), lambda i: (0, 0)),           # w2 row resident
                pl.BlockSpec(memory_space=pltpu.MemorySpace.SMEM),         # b2 scalar
            ],
            out_specs=pl.BlockSpec((tb_sub, LANES), lambda i: (i, 0)),
        ),
        compiler_params=pltpu.CompilerParams(
            dimension_semantics=("parallel",),
            vmem_limit_bytes=48 * 1024 * 1024,   # headroom for 8k-row tiles; < v7x physical
        ),
    )(x_in, w1p, b1p, w2p, b2p)

    # Lane-dense slab -> [B, 1]  (slab row r, col c is batch r*128+c); padded
    # / garbage rows beyond B are discarded here.
    y = out_slab.reshape(-1)[:B].reshape(B, OUTPUT_SIZE)
    return y.astype(out_dtype)


def init_params(key):
    # Deterministic init mimicking nn.Linear's uniform(-1/sqrt(fan_in), 1/sqrt(fan_in)).
    k1, k2, k3, k4 = jax.random.split(key, 4)
    bound1 = 1.0 / jnp.sqrt(INPUT_SIZE)
    bound2 = 1.0 / jnp.sqrt(HIDDEN_SIZE)
    w1 = jax.random.uniform(k1, (INPUT_SIZE, HIDDEN_SIZE), jnp.float32, -bound1, bound1)
    b1 = jax.random.uniform(k2, (1, HIDDEN_SIZE), jnp.float32, -bound1, bound1)
    w2 = jax.random.uniform(k3, (HIDDEN_SIZE, OUTPUT_SIZE), jnp.float32, -bound2, bound2)
    b2 = jax.random.uniform(k4, (1, OUTPUT_SIZE), jnp.float32, -bound2, bound2)
    return w1, b1, w2, b2


def reference_forward(x, w1, b1, w2, b2):
    # Pure f32 reference.
    h = jnp.maximum(x @ w1 + b1, 0.0)
    return h @ w2 + b2


def reference_forward_bf16(x, w1, b1, w2, b2):
    # Mirrors the kernel's numerics: bf16 fc1 inputs, f32 accumulation,
    # fc2 as an f32 multiply + sum.
    h = jnp.dot(x.astype(jnp.bfloat16), w1.astype(jnp.bfloat16),
                preferred_element_type=jnp.float32)
    h = jnp.maximum(h + b1.astype(jnp.float32), 0.0)
    y = jnp.sum(h * w2.astype(jnp.float32).reshape(1, HIDDEN_SIZE),
                axis=-1, keepdims=True)
    return y + b2.astype(jnp.float32).reshape(1, OUTPUT_SIZE)


if __name__ == "__main__":
    key = jax.random.PRNGKey(0)
    kx, kp, kx2 = jax.random.split(key, 3)

    w1, b1, w2, b2 = init_params(kp)

    # Small demo shape (batch=8): single-tile path.
    B = 8
    x = jax.random.normal(kx, (B, INPUT_SIZE), dtype=jnp.float32)
    out = jax.block_until_ready(mlp_forward(x, w1, b1, w2, b2))
    assert out.shape == (B, OUTPUT_SIZE)
    ref_match = reference_forward_bf16(x, w1, b1, w2, b2)
    ref_f32 = reference_forward(x, w1, b1, w2, b2)
    assert jnp.allclose(out, ref_match, atol=1e-4, rtol=1e-4)   # numerics-matched ref
    assert jnp.allclose(out, ref_f32, atol=2e-2, rtol=2e-2)     # f32 ref (bf16 inputs)

    # Larger ragged batch: exercises the multi-tile grid with a clipped
    # (partial) last x block and no x padding.  tile_rows=1024 is used only to
    # exercise the multi-tile path at small scale; production batches should
    # keep the default (>=4096-row) tile per the perf review.
    B2 = 2500
    x2 = jax.random.normal(kx2, (B2, INPUT_SIZE), dtype=jnp.float32)
    out2 = jax.block_until_ready(mlp_forward(x2, w1, b1, w2, b2, tile_rows=1024))
    assert out2.shape == (B2, OUTPUT_SIZE)
    ref2 = reference_forward_bf16(x2, w1, b1, w2, b2)
    assert jnp.allclose(out2, ref2, atol=1e-4, rtol=1e-4)

    print("KERNEL_OK")
</pallas_src>

<mosaic_0001>
module attributes {stable_mosaic.version = 11 : i64} {
  func.func @mlp_kernel(%arg0: i32, %arg1: memref<128x138xf32, #tpu.memory_space<vmem>>, %arg2: memref<138x128xbf16, #tpu.memory_space<vmem>>, %arg3: memref<1x128xf32, #tpu.memory_space<vmem>>, %arg4: memref<1x128xf32, #tpu.memory_space<vmem>>, %arg5: memref<1x1xf32, #tpu.memory_space<smem>>, %arg6: memref<1x128xf32, #tpu.memory_space<vmem>>) attributes {dimension_semantics = [#tpu.dimension_semantics<parallel>], iteration_bounds = array<i64: 1>, scalar_prefetch = 0 : i64, scratch_operands = 0 : i64, tpu.core_type = #tpu.core_type<tc>, window_params = [{transform_indices = @transform_0, window_bounds = array<i64: 128, 138>}, {pipeline_mode = #tpu.pipeline_mode<synchronous>, transform_indices = @transform_1, window_bounds = array<i64: 138, 128>}, {pipeline_mode = #tpu.pipeline_mode<synchronous>, transform_indices = @transform_2, window_bounds = array<i64: 1, 128>}, {pipeline_mode = #tpu.pipeline_mode<synchronous>, transform_indices = @transform_3, window_bounds = array<i64: 1, 128>}, {transform_indices = @transform_4, window_bounds = array<i64: 1, 1>}, {transform_indices = @transform_5, window_bounds = array<i64: 1, 128>}]} {
    %c0 = arith.constant 0 : index
    %c0_0 = arith.constant 0 : index
    %0 = vector.load %arg1[%c0, %c0_0] : memref<128x138xf32, #tpu.memory_space<vmem>>, vector<128x138xf32>
    %1 = arith.truncf %0 : vector<128x138xf32> to vector<128x138xbf16>
    %c0_1 = arith.constant 0 : index
    %c0_2 = arith.constant 0 : index
    %2 = vector.load %arg2[%c0_1, %c0_2] : memref<138x128xbf16, #tpu.memory_space<vmem>>, vector<138x128xbf16>
    %cst = arith.constant dense<0.000000e+00> : vector<128x128xf32>
    %3 = tpu.matmul %1, %2, %cst {dimension_numbers = #tpu.dot_dimension_numbers<[1], [0], [0], [1], [0, 0, 1, 1], [], []>} : vector<128x138xbf16>, vector<138x128xbf16>, vector<128x128xf32> -> vector<128x128xf32>
    %c0_3 = arith.constant 0 : index
    %c0_4 = arith.constant 0 : index
    %4 = vector.load %arg3[%c0_3, %c0_4] : memref<1x128xf32, #tpu.memory_space<vmem>>, vector<1x128xf32>
    %5 = vector.broadcast %4 : vector<1x128xf32> to vector<128x128xf32>
    %6 = arith.addf %3, %5 : vector<128x128xf32>
    %cst_5 = arith.constant 0.000000e+00 : f32
    %7 = vector.broadcast %cst_5 : f32 to vector<128x128xf32>
    %8 = arith.maximumf %6, %7 : vector<128x128xf32>
    %c0_6 = arith.constant 0 : index
    %c0_7 = arith.constant 0 : index
    %9 = vector.load %arg4[%c0_6, %c0_7] : memref<1x128xf32, #tpu.memory_space<vmem>>, vector<1x128xf32>
    %10 = vector.broadcast %9 : vector<1x128xf32> to vector<128x128xf32>
    %11 = arith.mulf %8, %10 : vector<128x128xf32>
    %12 = vector.shape_cast %11 : vector<128x128xf32> to vector<1x128x128xf32>
    %cst_8 = arith.constant dense<0.000000e+00> : vector<1x128xf32>
    %13 = vector.multi_reduction <add>, %12, %cst_8 [2] : vector<1x128x128xf32> to vector<1x128xf32>
    %c0_9 = arith.constant 0 : index
    %c0_10 = arith.constant 0 : index
    %14 = memref.load %arg5[%c0_9, %c0_10] : memref<1x1xf32, #tpu.memory_space<smem>>
    %15 = vector.broadcast %14 : f32 to vector<1x128xf32>
    %16 = arith.addf %13, %15 : vector<1x128xf32>
    %c0_11 = arith.constant 0 : index
    %c0_12 = arith.constant 0 : index
    %17 = vector.load %arg6[%c0_11, %c0_12] : memref<1x128xf32, #tpu.memory_space<vmem>>, vector<1x128xf32>
    tpu.vector_store %arg6[%c0_11, %c0_12], %16 {strides = array<i32>} : memref<1x128xf32, #tpu.memory_space<vmem>>, vector<1x128xf32>,
    return
  }
  func.func @transform_0(%arg0: i32) -> (i32, i32) {
    %c0_i32 = arith.constant 0 : i32
    %c0_i32_0 = arith.constant 0 : i32
    return %arg0, %c0_i32 : i32, i32
  }
  func.func @transform_1(%arg0: i32) -> (i32, i32) {
    %c0_i32 = arith.constant 0 : i32
    %c0_i32_0 = arith.constant 0 : i32
    %c0_i32_1 = arith.constant 0 : i32
    return %c0_i32, %c0_i32_0 : i32, i32
  }
  func.func @transform_2(%arg0: i32) -> (i32, i32) {
    %c0_i32 = arith.constant 0 : i32
    %c0_i32_0 = arith.constant 0 : i32
    %c0_i32_1 = arith.constant 0 : i32
    return %c0_i32, %c0_i32_0 : i32, i32
  }
  func.func @transform_3(%arg0: i32) -> (i32, i32) {
    %c0_i32 = arith.constant 0 : i32
    %c0_i32_0 = arith.constant 0 : i32
    %c0_i32_1 = arith.constant 0 : i32
    return %c0_i32, %c0_i32_0 : i32, i32
  }
  func.func @transform_4(%arg0: i32) -> (i32, i32) {
    %c0_i32 = arith.constant 0 : i32
    %c0_i32_0 = arith.constant 0 : i32
    %c0_i32_1 = arith.constant 0 : i32
    return %c0_i32, %c0_i32_0 : i32, i32
  }
  func.func @transform_5(%arg0: i32) -> (i32, i32) {
    %c0_i32 = arith.constant 0 : i32
    %c0_i32_0 = arith.constant 0 : i32
    return %arg0, %c0_i32 : i32, i32
  }
}

</mosaic_0001>

<bundles_post_ra>
// kernel: mlp_forward.1
= control target key start
LH: loop header
LB: loop body
LE: loop exit
PB: predicated region body
PF: predicated region fallthrough
CT: control target
= control target key end

     0   :  { %v543_v0 = vmov 0   ;;  %vm148_vm0 = vcmask 80896   ;;  %vm173_vm1 = vcmask 1044480   ;;  %vm390_vm2 = vcmask 130112   ;;  %s825_s1 = inlined_call_operand.vmem [shape: bf16[138,128], index: 1, kind: input, shape index: {}]   ;;  %s826_s0 = inlined_call_operand.vmem [shape: f32[128,138], index: 0, kind: input, shape index: {}]   ;;  %s827_s2 = inlined_call_operand.vmem [shape: f32[1,128], index: 2, kind: input, shape index: {}]   ;;  %s828_s3 = inlined_call_operand.vmem [shape: f32[1,128], index: 3, kind: input, shape index: {}]   ;;  %s829_s4 = inlined_call_operand.<no memory space> [shape: f32[1,1], index: 4, kind: input, shape index: {}]   ;;  %s830_s5 = inlined_call_operand.vmem [shape: f32[1,128], index: 5, kind: output, shape index: {}]  }
   0x1   :  { %177 = vmatprep.subr.bf16.mxu0 %v543_v0  ;;  %515 = vmatprep.subr.bf16.mxu1 %v543_v0  ;;  %v534_v1 = vld [vmem:[%s825_s1] sm:$0xff]   ;;  %v535_v2 = vld [vmem:[%s825_s1 + $0x8] sm:$0xff]   ;;  %v536_v3 = vld [vmem:[%s825_s1 + $0x10] sm:$0xff]   ;;  %vm397_vm3 = vcmask 195712   ;;  %vm404_vm4 = vcmask 261312   ;;  %vm411_vm5 = vcmask 326912  }
   0x2   :  { %178 = vmatpush1.bf16.msra.mxu0 %v534_v1  ;;  %524 = vmatpush1.bf16.msra.mxu1 %v534_v1  ;;  %v23_v4 = vld [vmem:[%s826_s0 + $0x8] sm:$0xff]  ;;  %v25_v5 = vld [vmem:[%s826_s0 + $0x18] sm:$0xff]  ;;  %v538_v11 = vld [vmem:[%s825_s1 + $0x20] sm:$0xff]   ;;  %vm418_vm6 = vcmask 392512   ;;  %vm425_vm7 = vcmask 458112   ;;  %vm432_vm8 = vcmask 523712  }
   0x3   :  { %179 = vmatprep.subr.bf16.mxu0 %v543_v0  ;;  %516 = vmatprep.subr.bf16.mxu1 %v543_v0  ;;  %v537_v6 = vld [vmem:[%s825_s1 + $0x18] sm:$0xff]   ;;  %v55_v7 = vpack.c.bf16 %v25_v5, %v23_v4  ;;  %v39_v8 = vld [vmem:[%s826_s0 + $0x88] sm:$0xff]  ;;  %v540_v13 = vld [vmem:[%s825_s1 + $0x30] sm:$0xff]   ;;  %vm439_vm9 = vcmask 589312   ;;  %vm446_vm10 = vcmask 654912   ;;  %vm453_vm11 = vcmask 720512  }
   0x4   :  { %v41_v9 = vld [vmem:[%s826_s0 + $0x98] sm:$0xff]  ;;  %v539_v12 = vld [vmem:[%s825_s1 + $0x28] sm:$0xff]   ;;  %v542_v15 = vld [vmem:[%s825_s1 + $0x40] sm:$0x1f]   ;;  %vm460_vm12 = vcmask 786112   ;;  %vm467_vm13 = vcmask 851712  }
   0x5   :  { %v63_v10 = vpack.c.bf16 %v41_v9, %v39_v8  ;;  %506 = vmatprep.mubr.msk.bf16.mxu0 %vm148_vm0, %v55_v7  ;;  %v541_v14 = vld [vmem:[%s825_s1 + $0x38] sm:$0xff]   ;;  %v22_v16 = vld [vmem:[%s826_s0] sm:$0xff]  ;;  %v24_v17 = vld [vmem:[%s826_s0 + $0x10] sm:$0xff]  ;;  %v175_v21 = vsel %vm173_vm1, %v542_v15, 0  ;;  %vm474_vm14 = vcmask 917312   ;;  %vm481_vm15 = vcmask 982912  }
   0x6   :  { %180 = vmatpush1.bf16.msra.mxu0 %v535_v2  ;;  %525 = vmatpush1.bf16.msra.mxu1 %v535_v2  ;;  %v38_v18 = vld [vmem:[%s826_s0 + $0x80] sm:$0xff]  ;;  %v40_v19 = vld [vmem:[%s826_s0 + $0x90] sm:$0xff]  ;;  %v27_v20 = vld [vmem:[%s826_s0 + $0x28] sm:$0xff]  ;;  %v54_v25 = vpack.c.bf16 %v24_v17, %v22_v16 }
   0x7   :  { %181 = vmatprep.subr.bf16.mxu0 %v543_v0  ;;  %517 = vmatprep.subr.bf16.mxu1 %v543_v0  ;;  %v29_v22 = vld [vmem:[%s826_s0 + $0x38] sm:$0xff]  ;;  %v43_v23 = vld [vmem:[%s826_s0 + $0xa8] sm:$0xff]  ;;  %v62_v26 = vpack.c.bf16 %v40_v19, %v38_v18  ;;  %v26_v29 = vld [vmem:[%s826_s0 + $0x20] sm:$0xff] }
   0x8   :  { %510 = vmatprep.mubr.msk.bf16.mxu1 %vm148_vm0, %v63_v10  ;;  %v45_v24 = vld [vmem:[%s826_s0 + $0xb8] sm:$0xff]  ;;  %v57_v27 = vpack.c.bf16 %v29_v22, %v27_v20  ;;  %v28_v30 = vld [vmem:[%s826_s0 + $0x30] sm:$0xff]  ;;  %v42_v31 = vld [vmem:[%s826_s0 + $0xa0] sm:$0xff] }
   0x9   :  { %v65_v28 = vpack.c.bf16 %v45_v24, %v43_v23  ;;  %v44_v32 = vld [vmem:[%s826_s0 + $0xb0] sm:$0xff]  ;;  %v31_v33 = vld [vmem:[%s826_s0 + $0x48] sm:$0xff]  ;;  %v33_v34 = vld [vmem:[%s826_s0 + $0x58] sm:$0xff]  ;;  %v56_v37 = vpack.c.bf16 %v28_v30, %v26_v29 }
   0xa   :  { %182 = vmatpush1.bf16.msra.mxu0 %v536_v3  ;;  %526 = vmatpush1.bf16.msra.mxu1 %v536_v3  ;;  %v47_v35 = vld [vmem:[%s826_s0 + $0xc8] sm:$0xff]  ;;  %v49_v36 = vld [vmem:[%s826_s0 + $0xd8] sm:$0xff]  ;;  %v64_v38 = vpack.c.bf16 %v44_v32, %v42_v31  ;;  %v59_v39 = vpack.c.bf16 %v33_v34, %v31_v33  ;;  %v30_v41 = vld [vmem:[%s826_s0 + $0x40] sm:$0xff] }
   0xb   :  { %183 = vmatprep.subr.bf16.mxu0 %v543_v0  ;;  %518 = vmatprep.subr.bf16.mxu1 %v543_v0  ;;  %v67_v40 = vpack.c.bf16 %v49_v36, %v47_v35  ;;  %v32_v42 = vld [vmem:[%s826_s0 + $0x50] sm:$0xff]  ;;  %v46_v43 = vld [vmem:[%s826_s0 + $0xc0] sm:$0xff]  ;;  %v35_v45 = vld [vmem:[%s826_s0 + $0x68] sm:$0xff] }
   0xc   :  { %v48_v44 = vld [vmem:[%s826_s0 + $0xd0] sm:$0xff]  ;;  %v37_v46 = vld [vmem:[%s826_s0 + $0x78] sm:$0xff]  ;;  %v51_v47 = vld [vmem:[%s826_s0 + $0xe8] sm:$0xff]  ;;  %v58_v49 = vpack.c.bf16 %v32_v42, %v30_v41 }
   0xd   :  { %v53_v48 = vld [vmem:[%s826_s0 + $0xf8] sm:$0xff]  ;;  %v66_v50 = vpack.c.bf16 %v48_v44, %v46_v43  ;;  %v61_v51 = vpack.c.bf16 %v37_v46, %v35_v45  ;;  %v34_v53 = vld [vmem:[%s826_s0 + $0x60] sm:$0xff]  ;;  %v36_v54 = vld [vmem:[%s826_s0 + $0x70] sm:$0xff] }
   0xe   :  { %184 = vmatpush1.bf16.msra.mxu0 %v537_v6  ;;  %527 = vmatpush1.bf16.msra.mxu1 %v537_v6  ;;  %v69_v52 = vpack.c.bf16 %v53_v48, %v51_v47  ;;  %v50_v55 = vld [vmem:[%s826_s0 + $0xe0] sm:$0xff]  ;;  %v52_v56 = vld [vmem:[%s826_s0 + $0xf0] sm:$0xff]  ;;  %v60_v57 = vpack.c.bf16 %v36_v54, %v34_v53 }
   0xf   :  { %185 = vmatprep.subr.bf16.mxu0 %v543_v0  ;;  %519 = vmatprep.subr.bf16.mxu1 %v543_v0  ;;  %v68_v58 = vpack.c.bf16 %v52_v56, %v50_v55  ;;  %v708_v59 = vld [vmem:[%s827_s2] ss:$0 sm:$0xff] }
  0x10   :  { %v715_v4 = vld [vmem:[%s828_s3] ss:$0 sm:$0xff] }
  0x12   :  { %186 = vmatpush1.bf16.msra.mxu0 %v538_v11  ;;  %528 = vmatpush1.bf16.msra.mxu1 %v538_v11 }
  0x13   :  { %187 = vmatprep.subr.bf16.mxu0 %v543_v0  ;;  %520 = vmatprep.subr.bf16.mxu1 %v543_v0 }
  0x16   :  { %188 = vmatpush1.bf16.msra.mxu0 %v539_v12  ;;  %529 = vmatpush1.bf16.msra.mxu1 %v539_v12 }
  0x17   :  { %189 = vmatprep.subr.bf16.mxu0 %v543_v0  ;;  %521 = vmatprep.subr.bf16.mxu1 %v543_v0 }
  0x1a   :  { %190 = vmatpush1.bf16.msra.mxu0 %v540_v13  ;;  %530 = vmatpush1.bf16.msra.mxu1 %v540_v13 }
  0x1b   :  { %191 = vmatprep.subr.bf16.mxu0 %v543_v0  ;;  %522 = vmatprep.subr.bf16.mxu1 %v543_v0 }
  0x1e   :  { %192 = vmatpush1.bf16.msra.mxu0 %v541_v14  ;;  %531 = vmatpush1.bf16.msra.mxu1 %v541_v14 }
  0x1f   :  { %193 = vmatprep.subr.bf16.mxu0 %v543_v0  ;;  %523 = vmatprep.subr.bf16.mxu1 %v543_v0 }
  0x22   :  { %194 = vmatpush1.bf16.msra.mxu0 %v175_v21  ;;  %532 = vmatpush1.bf16.msra.mxu1 %v175_v21 }
  0x25   :  { %210 = vmatmul.mubr.bf16.vlgmr.msra.gmra.mrb[0].mxu0 %v54_v25  ;;  %242 = vmatmul.mubr.bf16.vlgmr.msra.gmra.mrb[0].mxu1 %v62_v26 }
  0x26   :  { %507 = vmatprep.mubr.msk.bf16.mxu0 %vm148_vm0, %v57_v27  ;;  %511 = vmatprep.mubr.msk.bf16.mxu1 %vm148_vm0, %v65_v28 }
  0x2d   :  { %218 = vmatmul.mubr.bf16.gmra.mrb[4].mxu0 %v56_v37  ;;  %250 = vmatmul.mubr.bf16.gmra.mrb[4].mxu1 %v64_v38 }
  0x2e   :  { %508 = vmatprep.mubr.msk.bf16.mxu0 %vm148_vm0, %v59_v39  ;;  %512 = vmatprep.mubr.msk.bf16.mxu1 %vm148_vm0, %v67_v40 }
  0x35   :  { %226 = vmatmul.mubr.bf16.gmra.mrb[8].mxu0 %v58_v49  ;;  %258 = vmatmul.mubr.bf16.gmra.mrb[8].mxu1 %v66_v50 }
  0x36   :  { %509 = vmatprep.mubr.msk.bf16.mxu0 %vm148_vm0, %v61_v51  ;;  %513 = vmatprep.mubr.msk.bf16.mxu1 %vm148_vm0, %v69_v52  ;;  %vm488_vm0 = vcmask 1048512  }
  0x3d   :  { %234 = vmatmul.mubr.bf16.gmra.mrb[12].mxu0 %v60_v57  ;;  %266 = vmatmul.mubr.bf16.gmra.mrb[12].mxu1 %v68_v58 }
  0xf8   :  { %v211_v60 = vpop.f32.mrb[0].mxu0  ;;  %v243_v61 = vpop.f32.mrb[0].mxu1 }
  0xf9   :  { %v212_v62 = vadd.f32 %v708_v59, %v211_v60  ;;  %v213_v63 = vpop.f32.mrb[1].mxu0  ;;  %v244_v0 = vadd.f32 %v708_v59, %v243_v61  ;;  %v245_v1 = vpop.f32.mrb[1].mxu1 }
  0xfa   :  { %v214_v2 = vpop.f32.mrb[2].mxu0  ;;  %v246_v3 = vpop.f32.mrb[2].mxu1 }
  0xfb   :  { %v274_v5 = vmax.f32 %v212_v62, 0.0  ;;  %v282_v6 = vmax.f32 %v244_v0, 0.0  ;;  %v216_v7 = vpop.f32.mrb[3].mxu0  ;;  %v247_v8 = vadd.f32 %v708_v59, %v246_v3  ;;  %v248_v9 = vpop.f32.mrb[3].mxu1  ;;  %v215_v10 = vadd.f32 %v708_v59, %v214_v2 }
  0xfd   :  { %v283_v11 = vmax.f32 %v247_v8, 0.0  ;;  %v297_v12 = vmul.f32 %v715_v4, %v274_v5  ;;  %v305_v14 = vmul.f32 %v715_v4, %v282_v6  ;;  %v275_v17 = vmax.f32 %v215_v10, 0.0 }
  0xff   :  { %313 = vadd.xlane.f32.xlu0 %v297_v12  ;;  %v306_v13 = vmul.f32 %v715_v4, %v283_v11  ;;  %v298_v32 = vmul.f32 %v715_v4, %v275_v17 }
 0x100   :  { %v219_v15 = vpop.f32.mrb[4].mxu0  ;;  %v251_v16 = vpop.f32.mrb[4].mxu1 }
 0x101   :  { %v220_v18 = vadd.f32 %v708_v59, %v219_v15  ;;  %v221_v19 = vpop.f32.mrb[5].mxu0  ;;  %331 = vadd.xlane.f32.xlu1 %v306_v13  ;;  %v252_v20 = vadd.f32 %v708_v59, %v251_v16  ;;  %v253_v21 = vpop.f32.mrb[5].mxu1 }
 0x102   :  { %v222_v22 = vpop.f32.mrb[6].mxu0  ;;  %v254_v23 = vpop.f32.mrb[6].mxu1 }
 0x103   :  { %v276_v24 = vmax.f32 %v220_v18, 0.0  ;;  %v223_v25 = vadd.f32 %v708_v59, %v222_v22  ;;  %v224_v26 = vpop.f32.mrb[7].mxu0  ;;  %329 = vadd.xlane.f32.xlu0 %v305_v14  ;;  %v284_v27 = vmax.f32 %v252_v20, 0.0  ;;  %v255_v28 = vadd.f32 %v708_v59, %v254_v23  ;;  %v256_v29 = vpop.f32.mrb[7].mxu1 }
 0x105   :  { %v277_v30 = vmax.f32 %v223_v25, 0.0  ;;  %v299_v31 = vmul.f32 %v715_v4, %v276_v24  ;;  %v285_v33 = vmax.f32 %v255_v28, 0.0  ;;  %v307_v34 = vmul.f32 %v715_v4, %v284_v27 }
 0x107   :  { %317 = vadd.xlane.f32.xlu1 %v299_v31  ;;  %315 = vadd.xlane.f32.xlu0 %v298_v32  ;;  %v300_v39 = vmul.f32 %v715_v4, %v277_v30  ;;  %v308_v46 = vmul.f32 %v715_v4, %v285_v33 }
 0x108   :  { %v227_v35 = vpop.f32.mrb[8].mxu0  ;;  %v259_v36 = vpop.f32.mrb[8].mxu1 }
 0x109   :  { %v228_v37 = vadd.f32 %v708_v59, %v227_v35  ;;  %v229_v38 = vpop.f32.mrb[9].mxu0  ;;  %v261_v40 = vpop.f32.mrb[9].mxu1  ;;  %v260_v52 = vadd.f32 %v708_v59, %v259_v36 }
 0x10a   :  { %v230_v41 = vpop.f32.mrb[10].mxu0  ;;  %v262_v42 = vpop.f32.mrb[10].mxu1 }
 0x10b   :  { %v278_v43 = vmax.f32 %v228_v37, 0.0  ;;  %v231_v44 = vadd.f32 %v708_v59, %v230_v41  ;;  %v232_v45 = vpop.f32.mrb[11].mxu0  ;;  %319 = vadd.xlane.f32.xlu1 %v300_v39  ;;  %333 = vadd.xlane.f32.xlu0 %v307_v34  ;;  %v264_v47 = vpop.f32.mrb[11].mxu1  ;;  %v263_v60 = vadd.f32 %v708_v59, %v262_v42  ;;  %v286_v2 = vmax.f32 %v260_v52, 0.0 }
 0x10d   :  { %v279_v48 = vmax.f32 %v231_v44, 0.0  ;;  %v301_v49 = vmul.f32 %v715_v4, %v278_v43  ;;  %v287_v6 = vmax.f32 %v263_v60, 0.0  ;;  %v309_v10 = vmul.f32 %v715_v4, %v286_v2 }
 0x10f   :  { %335 = vadd.xlane.f32.xlu1 %v308_v46  ;;  %321 = vadd.xlane.f32.xlu0 %v301_v49  ;;  %v302_v55 = vmul.f32 %v715_v4, %v279_v48  ;;  %v310_v12 = vmul.f32 %v715_v4, %v287_v6 }
 0x110   :  { %v235_v50 = vpop.f32.mrb[12].mxu0  ;;  %v267_v51 = vpop.f32.mrb[12].mxu1 }
 0x111   :  { %v236_v53 = vadd.f32 %v708_v59, %v235_v50  ;;  %v237_v54 = vpop.f32.mrb[13].mxu0  ;;  %v269_v56 = vpop.f32.mrb[13].mxu1  ;;  %v268_v0 = vadd.f32 %v708_v59, %v267_v51 }
 0x112   :  { %v238_v57 = vpop.f32.mrb[14].mxu0  ;;  %v270_v58 = vpop.f32.mrb[14].mxu1 }
 0x113   :  { %v280_v61 = vmax.f32 %v236_v53, 0.0  ;;  %v239_v62 = vadd.f32 %v708_v59, %v238_v57  ;;  %v240_v63 = vpop.f32.mrb[15].mxu0  ;;  %323 = vadd.xlane.f32.xlu1 %v302_v55  ;;  %v272_v1 = vpop.f32.mrb[15].mxu1  ;;  %v288_v7 = vmax.f32 %v268_v0, 0.0  ;;  %v271_v8 = vadd.f32 %v708_v59, %v270_v58 }
 0x114   :  { %v379_v59 = vlaneseq }
 0x115   :  { %v281_v3 = vmax.f32 %v239_v62, 0.0  ;;  %v303_v5 = vmul.f32 %v715_v4, %v280_v61  ;;  %v289_v11 = vmax.f32 %v271_v8, 0.0  ;;  %v311_v13 = vmul.f32 %v715_v4, %v288_v7 }
 0x116   :  { %v749_v18 = vand.u32 127, %v379_v59  ;;  %v752_v22 = vshrl.u32 %v379_v59, 7 }
 0x117   :  { %325 = vadd.xlane.f32.xlu0 %v303_v5  ;;  %v304_v9 = vmul.f32 %v715_v4, %v281_v3  ;;  %v312_v14 = vmul.f32 %v715_v4, %v289_v11  ;;  %v757_v4 = vstv %s829_s4 }
 0x118   :  { %v385_v21 = vadd.s32 4294967288, %v749_v18  ;;  %v760_v25 = vadd.s32 4294967224, %v749_v18  ;;  %v392_v26 = vadd.s32 4294967280, %v749_v18  ;;  %v399_v27 = vadd.s32 4294967272, %v749_v18 }
 0x119   :  { %327 = vadd.xlane.f32.xlu1 %v304_v9  ;;  %v406_v30 = vadd.s32 4294967264, %v749_v18  ;;  %v383_v31 = vsub.s32 %v749_v18, %v752_v22  ;;  %v434_v33 = vadd.s32 4294967232, %v749_v18  ;;  %v413_v36 = vadd.s32 4294967256, %v749_v18 }
 0x11a   :  { %v388_v28 = vsub.s32 %v385_v21, %v752_v22  ;;  %v444_v37 = vsub.s32 %v760_v25, %v752_v22  ;;  %v395_v38 = vsub.s32 %v392_v26, %v752_v22  ;;  %v402_v40 = vsub.s32 %v399_v27, %v752_v22 }
 0x11b   :  { %337 = vadd.xlane.f32.xlu0 %v309_v10  ;;  %v448_v43 = vadd.s32 4294967216, %v749_v18  ;;  %v780_v44 = vadd.s32 4294967208, %v749_v18  ;;  %v409_v45 = vsub.s32 %v406_v30, %v752_v22  ;;  %v420_v47 = vadd.s32 4294967248, %v749_v18 }
 0x11c   :  { %v437_v49 = vsub.s32 %v434_v33, %v752_v22  ;;  %v416_v50 = vsub.s32 %v413_v36, %v752_v22  ;;  %v427_v52 = vadd.s32 4294967240, %v749_v18  ;;  %v462_v1 = vadd.s32 4294967200, %v749_v18 }
 0x11d   :  { %339 = vadd.xlane.f32.xlu1 %v310_v12  ;;  %v451_v57 = vsub.s32 %v448_v43, %v752_v22  ;;  %v458_v58 = vsub.s32 %v780_v44, %v752_v22  ;;  %v423_v61 = vsub.s32 %v420_v47, %v752_v22  ;;  %v469_v8 = vadd.s32 4294967192, %v749_v18 }
 0x11e   :  { %v430_v0 = vsub.s32 %v427_v52, %v752_v22  ;;  %v476_v9 = vadd.s32 4294967184, %v749_v18  ;;  %v465_v59 = vsub.s32 %v462_v1, %v752_v22 }
 0x11f   :  { %341 = vadd.xlane.f32.xlu0 %v311_v13  ;;  %v472_v26 = vsub.s32 %v469_v8, %v752_v22 }
 0x120   :  { %v479_v30 = vsub.s32 %v476_v9, %v752_v22 }
 0x121   :  { %343 = vadd.xlane.f32.xlu1 %v312_v14 }
 0x18c   :  { %v314_v15 = vpop.xlane.xlu0 %313 }
 0x18d   :  { %v347_v32 = vadd.f32 %v757_v4, %v314_v15 }
 0x18e   :  { %v747_v16 = vpop.xlane.xlu1 %331 }
 0x18f   :  { %v384_v48 = vrot.slane %v347_v32, %v383_v31  ;;  %v356_v10 = vadd.f32 %v757_v4, %v747_v16  ;;  %v483_v16 = vadd.s32 4294967176, %v749_v18 }
 0x190   :  { %v330_v17 = vpop.xlane.xlu0 %329 }
 0x191   :  { %v355_v5 = vadd.f32 %v757_v4, %v330_v17  ;;  %v445_v27 = vrot.slane %v356_v10, %v444_v37  ;;  %v486_v36 = vsub.s32 %v483_v16, %v752_v22 }
 0x194   :  { %v318_v19 = vpop.xlane.xlu1 %317  ;;  %v316_v20 = vpop.xlane.xlu0 %315 }
 0x195   :  { %v348_v29 = vadd.f32 %v757_v4, %v316_v20  ;;  %v349_v39 = vadd.f32 %v757_v4, %v318_v19 }
 0x197   :  { %v389_v41 = vrot.slane %v348_v29, %v388_v28  ;;  %v396_v53 = vrot.slane %v349_v39, %v395_v38 }
 0x198   :  { %v320_v23 = vpop.xlane.xlu1 %319  ;;  %v334_v24 = vpop.xlane.xlu0 %333 }
 0x199   :  { %v350_v42 = vadd.f32 %v757_v4, %v320_v23  ;;  %v391_v55 = vsel %vm390_vm2, %v389_v41, %v384_v48  ;;  %v357_v14 = vadd.f32 %v757_v4, %v334_v24  ;;  %v438_v23 = vrot.slane %v355_v5, %v437_v49 }
 0x19a   :  { %v398_v2 = vsel %vm397_vm3, %v396_v53, %v391_v55 }
 0x19b   :  { %v403_v56 = vrot.slane %v350_v42, %v402_v40  ;;  %v452_v31 = vrot.slane %v357_v14, %v451_v57 }
 0x19c   :  { %v336_v34 = vpop.xlane.xlu1 %335  ;;  %v322_v35 = vpop.xlane.xlu0 %321 }
 0x19d   :  { %v351_v46 = vadd.f32 %v757_v4, %v322_v35  ;;  %v405_v6 = vsel %vm404_vm4, %v403_v56, %v398_v2  ;;  %v358_v19 = vadd.f32 %v757_v4, %v336_v34 }
 0x19f   :  { %v410_v60 = vrot.slane %v351_v46, %v409_v45  ;;  %v459_v33 = vrot.slane %v358_v19, %v458_v58 }
 0x1a0   :  { %v324_v51 = vpop.xlane.xlu1 %323 }
 0x1a1   :  { %v352_v54 = vadd.f32 %v757_v4, %v324_v51  ;;  %v412_v11 = vsel %vm411_vm5, %v410_v60, %v405_v6 }
 0x1a3   :  { %v417_v62 = vrot.slane %v352_v54, %v416_v50 }
 0x1a4   :  { %v326_v63 = vpop.xlane.xlu0 %325 }
 0x1a5   :  { %v353_v3 = vadd.f32 %v757_v4, %v326_v63  ;;  %v419_v15 = vsel %vm418_vm6, %v417_v62, %v412_v11 }
 0x1a6   :  { %v328_v7 = vpop.xlane.xlu1 %327 }
 0x1a7   :  { %v424_v12 = vrot.slane %v353_v3, %v423_v61  ;;  %v354_v13 = vadd.f32 %v757_v4, %v328_v7 }
 0x1a8   :  { %v338_v17 = vpop.xlane.xlu0 %337 }
 0x1a9   :  { %v426_v20 = vsel %vm425_vm7, %v424_v12, %v419_v15  ;;  %v431_v21 = vrot.slane %v354_v13, %v430_v0  ;;  %v359_v25 = vadd.f32 %v757_v4, %v338_v17 }
 0x1aa   :  { %v340_v24 = vpop.xlane.xlu1 %339 }
 0x1ab   :  { %v433_v28 = vsel %vm432_vm8, %v431_v21, %v426_v20  ;;  %v360_v29 = vadd.f32 %v757_v4, %v340_v24  ;;  %v466_v38 = vrot.slane %v359_v25, %v465_v59 }
 0x1ac   :  { %v440_v32 = vsel %vm439_vm9, %v438_v23, %v433_v28  ;;  %v342_v18 = vpop.xlane.xlu0 %341 }
 0x1ad   :  { %v447_v34 = vsel %vm446_vm10, %v445_v27, %v440_v32  ;;  %v361_v35 = vadd.f32 %v757_v4, %v342_v18  ;;  %v473_v41 = vrot.slane %v360_v29, %v472_v26 }
 0x1ae   :  { %v454_v37 = vsel %vm453_vm11, %v452_v31, %v447_v34  ;;  %v344_v39 = vpop.xlane.xlu1 %343 }
 0x1af   :  { %v461_v40 = vsel %vm460_vm12, %v459_v33, %v454_v37  ;;  %v480_v42 = vrot.slane %v361_v35, %v479_v30  ;;  %v362_v43 = vadd.f32 %v757_v4, %v344_v39 }
 0x1b0   :  { %v468_v44 = vsel %vm467_vm13, %v466_v38, %v461_v40 }
 0x1b1   :  { %v475_v45 = vsel %vm474_vm14, %v473_v41, %v468_v44  ;;  %v487_v46 = vrot.slane %v362_v43, %v486_v36 }
 0x1b2   :  { %v482_v47 = vsel %vm481_vm15, %v480_v42, %v475_v45 }
 0x1b3   :  { %v489_v48 = vsel %vm488_vm0, %v487_v46, %v482_v47 }
 0x1b4   :  { %491 = vst [vmem:[%s830_s5] sm:$0x1] %v489_v48 }

</bundles_post_ra>
